<compile_context>
chip_gen: v7x
topology: tpu7x:2x2x1
jax: 0.10.0
libtpu: 0.0.40
codegen_flags: <defaults>
</compile_context>

<pallas_src>
import numpy as np
import jax
import jax.numpy as jnp
from jax.experimental import pallas as pl
from jax.experimental.pallas import tpu as pltpu


def _round_up(x, m):
    return ((x + m - 1) // m) * m


def _build_expansion(dim1, dim2, B1, B2, out_pad):
    """Scaled one-hot expansion matrix E (dim, out_pad).

    E[e, e*B + j] = 2^-(B-1-j)  so that  int(v @ E) & 1 == (v >> (B-1-j)) & 1.
    Padding columns (>= dim1*B1 + dim2*B2) stay 0 -> output bit 0.
    """
    E = np.zeros((dim1 + dim2, out_pad), np.float32)
    col = 0
    for e in range(dim1):
        for j in range(B1):
            E[e, col] = 2.0 ** -(B1 - 1 - j)      # MSB first within each element
            col += 1
    for e in range(dim2):
        for j in range(B2):
            E[dim1 + e, col] = 2.0 ** -(B2 - 1 - j)
            col += 1
    return E


def _mixquant_kernel(x_ref, e_ref, o_ref):
    # torch.round (half-to-even) then emulate the uint8 cast via wrap mod 256.
    # (torch's float->uint8 cast of negatives is UB; we pick the wrap behaviour.)
    v = jnp.round(x_ref[...].astype(jnp.float32))
    v_u8 = jnp.bitwise_and(v.astype(jnp.int32), 255)
    # bf16 matmul is exact: integer values <= 255, E entries are powers of two,
    # one nonzero term per output column, f32 accumulation (requires n_q_bit<=8).
    expanded = jnp.dot(v_u8.astype(jnp.bfloat16), e_ref[...],
                       preferred_element_type=jnp.float32)
    bits = jnp.bitwise_and(expanded.astype(jnp.int32), 1)
    o_ref[...] = bits.astype(jnp.float32)


def _pick_bm(batch, dim, out_pad, e_bytes, budget_bytes=48 << 20):
    bm = 512 if batch >= 512 else _round_up(batch, 8)

    def footprint(b):
        # double-buffered input + output tiles (f32) + double-buffered E (bf16)
        return 2 * b * dim * 4 + 2 * b * out_pad * 4 + 2 * e_bytes

    while bm > 8 and footprint(bm) > budget_bytes:
        bm = _round_up(bm // 2, 8)
    return bm, footprint(bm)


def mix_quantization_forward(x, *, mixq_factor, n_q_bit):
    assert 1 <= n_q_bit <= 8, "bf16-exact expansion requires values <= 255"
    batch, dim = x.shape
    dim1 = int(round(dim * mixq_factor))
    assert dim1 > 0
    dim2 = dim - dim1
    B1, B2 = n_q_bit - 1, n_q_bit
    out_dim = dim1 * B1 + dim2 * B2
    out_pad = _round_up(out_dim, 128)           # lane-dense output stores

    E = jnp.asarray(_build_expansion(dim1, dim2, B1, B2, out_pad),
                    dtype=jnp.bfloat16)         # halves E's VMEM / DMA bytes

    bm, footprint = _pick_bm(batch, dim, out_pad, dim * out_pad * 2)
    batch_pad = _round_up(batch, bm)
    xp = x if batch_pad == batch else jnp.pad(x, ((0, batch_pad - batch), (0, 0)))
    grid = (batch_pad // bm,)

    vmem_limit = min(64 << 20, max(footprint + (4 << 20), 16 << 20))

    out = pl.pallas_call(
        _mixquant_kernel,
        out_shape=jax.ShapeDtypeStruct((batch_pad, out_pad), jnp.float32),
        grid=grid,
        in_specs=[
            pl.BlockSpec((bm, dim), lambda i: (i, 0)),
            pl.BlockSpec((dim, out_pad), lambda i: (0, 0)),   # resident across grid
        ],
        out_specs=pl.BlockSpec((bm, out_pad), lambda i: (i, 0)),
        compiler_params=pltpu.CompilerParams(
            dimension_semantics=("parallel",),
            vmem_limit_bytes=int(vmem_limit)),
    )(xp, E)
    return out[:batch, :out_dim]


# ---------------------------- reference (numpy) ----------------------------
def _ref_num2bit(v, B):
    v = (np.round(v).astype(np.int64)) % 256
    batch, d = v.shape
    out = np.zeros((batch, d * B), np.float32)
    for e in range(d):
        for j in range(B):
            out[:, e * B + j] = (v[:, e] >> (B - 1 - j)) & 1
    return out


def _ref_mixquant(x, mixq_factor, n_q_bit):
    batch, dim = x.shape
    dim1 = int(round(dim * mixq_factor))
    x1 = _ref_num2bit(x[:, :dim1], n_q_bit - 1)
    x2 = _ref_num2bit(x[:, dim1:], n_q_bit)
    return np.concatenate([x1, x2], axis=-1)


if __name__ == "__main__":
    # cfg: mixq_factor=0.5, n_q_bit=4 -> dim1=16 (3 bits), dim2=16 (4 bits),
    # out_dim = 112 (padded to 128 inside the kernel).
    mixq_factor = 0.5
    n_q_bit = 4
    dim = 32
    key = jax.random.PRNGKey(0)

    # batch=8: single block; batch=20: exercises row padding; batch=1040:
    # exercises the multi-step pipelined grid (bm=512, 3 steps).
    for batch in (8, 20, 1040):
        key, sub = jax.random.split(key)
        # typical quantizer input: values scaled into [0, 2^B - 1]
        x = jax.random.uniform(sub, (batch, dim), dtype=jnp.float32,
                               minval=0.0, maxval=float(2 ** n_q_bit - 1))
        out = mix_quantization_forward(x, mixq_factor=mixq_factor,
                                       n_q_bit=n_q_bit)
        out = jax.block_until_ready(out)
        ref = _ref_mixquant(np.asarray(x), mixq_factor, n_q_bit)
        assert out.shape == ref.shape, (out.shape, ref.shape)
        np.testing.assert_allclose(np.asarray(out), ref, atol=0.0, rtol=0.0)

    print("KERNEL_OK")
</pallas_src>

<mosaic_0001>
module attributes {stable_mosaic.version = 11 : i64} {
  func.func @_mixquant_kernel(%arg0: i32, %arg1: memref<8x32xf32, #tpu.memory_space<vmem>>, %arg2: memref<32x128xbf16, #tpu.memory_space<vmem>>, %arg3: memref<8x128xf32, #tpu.memory_space<vmem>>) attributes {dimension_semantics = [#tpu.dimension_semantics<parallel>], iteration_bounds = array<i64: 1>, scalar_prefetch = 0 : i64, scratch_operands = 0 : i64, tpu.core_type = #tpu.core_type<tc>, window_params = [{transform_indices = @transform_0, window_bounds = array<i64: 8, 32>}, {pipeline_mode = #tpu.pipeline_mode<synchronous>, transform_indices = @transform_1, window_bounds = array<i64: 32, 128>}, {transform_indices = @transform_2, window_bounds = array<i64: 8, 128>}]} {
    %c0 = arith.constant 0 : index
    %c0_0 = arith.constant 0 : index
    %0 = vector.load %arg1[%c0, %c0_0] : memref<8x32xf32, #tpu.memory_space<vmem>>, vector<8x32xf32>
    %1 = math.roundeven %0 : vector<8x32xf32>
    %2 = arith.fptosi %1 : vector<8x32xf32> to vector<8x32xi32>
    %c255_i32 = arith.constant 255 : i32
    %3 = vector.broadcast %c255_i32 : i32 to vector<8x32xi32>
    %4 = arith.andi %2, %3 : vector<8x32xi32>
    %5 = arith.sitofp %4 : vector<8x32xi32> to vector<8x32xbf16>
    %c0_1 = arith.constant 0 : index
    %c0_2 = arith.constant 0 : index
    %6 = vector.load %arg2[%c0_1, %c0_2] : memref<32x128xbf16, #tpu.memory_space<vmem>>, vector<32x128xbf16>
    %cst = arith.constant dense<0.000000e+00> : vector<8x128xf32>
    %7 = tpu.matmul %5, %6, %cst {dimension_numbers = #tpu.dot_dimension_numbers<[1], [0], [0], [1], [0, 0, 1, 1], [], []>} : vector<8x32xbf16>, vector<32x128xbf16>, vector<8x128xf32> -> vector<8x128xf32>
    %8 = arith.fptosi %7 : vector<8x128xf32> to vector<8x128xi32>
    %c1_i32 = arith.constant 1 : i32
    %9 = vector.broadcast %c1_i32 : i32 to vector<8x128xi32>
    %10 = arith.andi %8, %9 : vector<8x128xi32>
    %11 = arith.sitofp %10 : vector<8x128xi32> to vector<8x128xf32>
    %c0_3 = arith.constant 0 : index
    %c0_4 = arith.constant 0 : index
    %12 = vector.load %arg3[%c0_3, %c0_4] : memref<8x128xf32, #tpu.memory_space<vmem>>, vector<8x128xf32>
    tpu.vector_store %arg3[%c0_3, %c0_4], %11 {strides = array<i32>} : memref<8x128xf32, #tpu.memory_space<vmem>>, vector<8x128xf32>,
    return
  }
  func.func @transform_0(%arg0: i32) -> (i32, i32) {
    %c0_i32 = arith.constant 0 : i32
    %c0_i32_0 = arith.constant 0 : i32
    return %arg0, %c0_i32 : i32, i32
  }
  func.func @transform_1(%arg0: i32) -> (i32, i32) {
    %c0_i32 = arith.constant 0 : i32
    %c0_i32_0 = arith.constant 0 : i32
    %c0_i32_1 = arith.constant 0 : i32
    return %c0_i32, %c0_i32_0 : i32, i32
  }
  func.func @transform_2(%arg0: i32) -> (i32, i32) {
    %c0_i32 = arith.constant 0 : i32
    %c0_i32_0 = arith.constant 0 : i32
    return %arg0, %c0_i32 : i32, i32
  }
}

</mosaic_0001>

<bundles_post_ra>
// kernel: tpu_custom_call.1
= control target key start
LH: loop header
LB: loop body
LE: loop exit
PB: predicated region body
PF: predicated region fallthrough
CT: control target
= control target key end

     0   :  { %7 = vsyncpa [#allocation3], 0  ;;  %s289_s0 = inlined_call_operand.hbm [shape: f32[8,32], index: 0, kind: input, shape index: {}]   ;;  %s290_s1 = inlined_call_operand.hbm [shape: bf16[32,128], index: 1, kind: input, shape index: {}]   ;;  %s291_s2 = inlined_call_operand.hbm [shape: f32[8,128], index: 2, kind: output, shape index: {}]  }
   0x1   :  { %8 = vsyncpa [#allocation6], 0 }
   0x2   :  { %9 = vsyncpa [#allocation4], 0  ;;  %s224_s9 = smov [#allocation2]   ;;  %s225_s11 = smov [#allocation5]  }
   0x3   :  { %s16_s10 = sshll.u32 %s224_s9, 4  ;;  %s25_s12 = sshll.u32 %s225_s11, 4  ;;  %s17_s10 = int_to_ptr.vmem [resolvable:$true] %s16_s10  ;;  %s246_s12 = int_to_ptr.vmem [resolvable:$true] %s25_s12 }
   0x4   :  { %s152_s15 = scalar_lea.hbm %s289_s0, 128 }
   0x5   :  { %p153_p0 = scmp.ne.s32.totalorder %s289_s0, %s152_s15  ;;  %p156_p1 = scmp.lt.u32.totalorder %s152_s15, %s289_s0 }
   0x7   :  { %p158_p2 = pnand %p156_p1, %p153_p0 }
   0x9   :  { %161 = shalt.err (!%p158_p2)
}
   0xa   :  { %s162_s20 = scalar_lea.vmem %s17_s10, 128  ;;  %p167_p4 = scmp.lt.s32.totalorder %s17_s10, %s17_s10 }
   0xb   :  { %p163_p3 = scmp.ne.s32.totalorder %s17_s10, %s162_s20  ;;  %p168_p5 = scmp.lt.s32.totalorder %s162_s20, %s162_s20 }
   0xd   :  { %p169_p6 = por %p168_p5, %p167_p4 }
   0xf   :  { %p170_p7 = pnand %p169_p6, %p163_p3 }
  0x11   :  { %173 = shalt.err (!%p170_p7)
}
  0x12   :  { %19 = dma.hbm_to_vmem [thread:$0]  %s289_s0, 128, %s17_s10, [#allocation3]  }
  0x13   :  { %s174_s25 = scalar_lea.hbm %s290_s1, 256 }
  0x14   :  { %p175_p8 = scmp.ne.s32.totalorder %s290_s1, %s174_s25  ;;  %p178_p9 = scmp.lt.u32.totalorder %s174_s25, %s290_s1 }
  0x16   :  { %p180_p10 = pnand %p178_p9, %p175_p8 }
  0x18   :  { %183 = shalt.err (!%p180_p10)
}
  0x19   :  { %s184_s30 = scalar_lea.vmem %s246_s12, 256  ;;  %p189_p12 = scmp.lt.s32.totalorder %s246_s12, %s246_s12 }
  0x1a   :  { %p185_p11 = scmp.ne.s32.totalorder %s246_s12, %s184_s30  ;;  %p190_p13 = scmp.lt.s32.totalorder %s184_s30, %s184_s30 }
  0x1c   :  { %p191_p0 = por %p190_p13, %p189_p12 }
  0x1e   :  { %p192_p1 = pnand %p191_p0, %p185_p11 }
  0x20   :  { %195 = shalt.err (!%p192_p1)
}
  0x21   :  { %s226_s0 = smov 64   ;;  %s227_s3 = smov 4  }
  0x22   :  { %31 = dma.hbm_to_vmem [thread:$0]  %s290_s1, 256, %s246_s12, [#allocation6], %s226_s0, %s226_s0, %s227_s3  }
  0x23   :  { %218 = dma.done.wait [#allocation3], 128  }
  0x24   :  { %219 = vsyncadd [#allocation3], 4294967168 }
  0x25   :  { %220 = dma.done.wait [#allocation6], 256  }
  0x26   :  { %221 = vsyncadd [#allocation6], 4294967040  ;;  %v228_v0 = vmov 0.0   ;;  %vm229_vm0 = vmmov 0   ;;  %v150_v1 = vld [vmem:[#allocation5] sm:$0xff]   ;;  %v151_v2 = vld [vmem:[#allocation5 + $0x8] sm:$0xff]  }
  0x27   :  { %130 = vmatprep.subr.bf16.mxu0 %v228_v0  ;;  %134 = vmatprep.mubr.msk.bf16.mxu0 %vm229_vm0, %v228_v0  ;;  %v39_v3 = vld [vmem:[#allocation2] sm:$0xff]  ;;  %vm60_vm1 = vcmask 261120   ;;  %s230_s1 = smov [#allocation7]  }
  0x28   :  { %131 = vmatpush3.bf16.msra.mxu0 %v150_v1  ;;  %v140_v4 = vcvt.f32.s32 %v39_v3  ;;  %s114_s6 = sshll.u32 %s230_s1, 4  ;;  %s115_s6 = int_to_ptr.vmem [resolvable:$true] %s114_s6 }
  0x29   :  { %132 = vmatprep.subr.bf16.mxu0 %v228_v0  ;;  %s196_s7 = scalar_lea.vmem %s115_s6, 128  ;;  %p201_p3 = scmp.lt.s32.totalorder %s115_s6, %s115_s6 }
  0x2a   :  { %v41_v5 = vand.u32 255, %v140_v4  ;;  %p197_p2 = scmp.ne.s32.totalorder %s115_s6, %s196_s7  ;;  %p202_p4 = scmp.lt.s32.totalorder %s196_s7, %s196_s7 }
  0x2c   :  { %133 = vmatpush3.bf16.msra.mxu0 %v151_v2  ;;  %v42_v6 = vcvt.s32.f32 %v41_v5  ;;  %p203_p5 = por %p202_p4, %p201_p3 }
  0x2e   :  { %v43_v7 = vpack.c.bf16 %v42_v6, %v42_v6  ;;  %p204_p6 = pnand %p203_p5, %p197_p2 }
  0x30   :  { %135 = vmatmul.mubr.msk.bf16.vlgmr.msra.gmra.mrb[0].mxu0 %vm60_vm1, %v43_v7 }
 0x103   :  { %v98_v8 = vpop.f32.mrb[0].mxu0 }
 0x104   :  { %v141_v9 = vtrunc.f32 %v98_v8  ;;  %v136_v10 = vpop.f32.mrb[1].mxu0 }
 0x105   :  { %v101_v11 = vpop.f32.mrb[2].mxu0 }
 0x106   :  { %v142_v12 = vcvt.f32.s32 %v141_v9  ;;  %v137_v13 = vpop.f32.mrb[3].mxu0 }
 0x108   :  { %v105_v14 = vand.u32 1, %v142_v12 }
 0x10a   :  { %v106_v15 = vcvt.s32.f32 %v105_v14 }
 0x10c   :  { %107 = vst [vmem:[#allocation7] sm:$0xff] %v106_v15 }
 0x10d   :  { %207 = shalt.err (!%p204_p6)
}
 0x10e   :  { %s208_s10 = scalar_lea.hbm %s291_s2, 128 }
 0x10f   :  { %p209_p7 = scmp.ne.s32.totalorder %s291_s2, %s208_s10  ;;  %p212_p8 = scmp.lt.u32.totalorder %s208_s10, %s291_s2 }
 0x111   :  { %p214_p9 = pnand %p212_p8, %p209_p7 }
 0x113   :  { %217 = shalt.err (!%p214_p9)
}
 0x114   :  { %117 = dma.vmem_to_hbm [thread:$0]  %s115_s6, 128, %s291_s2, [#allocation4]  }
 0x115   :  { %222 = dma.done.wait [#allocation4], 128  }
 0x116   :  { %223 = vsyncadd [#allocation4], 4294967168 }
 0x117   :  { %121 = vsyncpa [#allocation3], 1 }
 0x118   :  { %122 = vsyncpa [#allocation6], 1 }
 0x119   :  { %123 = vsyncpa [#allocation4], 1 }

</bundles_post_ra>
